<compile_context>
chip_gen: v6e
topology: v6e:2x2x1
jax: 0.10.0
libtpu: 0.0.40
codegen_flags: <defaults>
</compile_context>

<pallas_src>
import functools

import jax
import jax.numpy as jnp
from jax.experimental import pallas as pl
from jax.experimental.pallas import tpu as pltpu


_LANE = 128
_SUBLANE = 8
_VMEM_BUDGET = 20 * 1024 * 1024      # target for pipelined blocks + scratch
_VMEM_LIMIT = 32 * 1024 * 1024       # explicit scoped-VMEM limit (safe on v5e/v6e/v7x)


def _cdiv(a, b):
    return -(-a // b)


def _round_up(a, b):
    return _cdiv(a, b) * b


def _pick_batch_tile(B, cap):
    """Largest divisor of B that is <= cap."""
    cap = int(max(1, min(B, cap)))
    for d in range(cap, 0, -1):
        if B % d == 0:
            return d
    return 1


def _pick_row_tile(n, cap):
    """Largest divisor of n that is <= cap and a multiple of 8 (else n itself)."""
    cap = int(max(1, cap))
    if n <= cap:
        return n
    for d in range(min(n, cap), 0, -1):
        if n % d == 0 and d % _SUBLANE == 0:
            return d
    return n  # no legal smaller row tile; fall back to full rows


def _gconv_kernel(*refs, with_bn):
    """Fused gmul + fc (+ BatchNorm statistics).

    with_bn=True  refs: w(Bt,Tn,N*J), x(Bt,N,Fin), fcw(Fin,J*Fp),
                        y(Bt,Tn,Fp), stats(1,2,Fp), xf_scratch(Bt,N*J,Fp)
    with_bn=False refs: w, x, fcw, bias(1,Fp), y, xf_scratch
    """
    if with_bn:
        w_ref, x_ref, fcw_ref, y_ref, st_ref, xf_ref = refs
        bias_ref = None
    else:
        w_ref, x_ref, fcw_ref, bias_ref, y_ref, xf_ref = refs
        st_ref = None

    ni = pl.program_id(1)

    # xF = x @ fcw2, computed once per batch tile and reused across row tiles.
    @pl.when(ni == 0)
    def _():
        bt, n, fin = x_ref.shape
        x2d = x_ref[...].reshape(bt * n, fin)
        xf = jnp.dot(x2d, fcw_ref[...], preferred_element_type=jnp.float32)
        xf_ref[...] = xf.reshape(xf_ref.shape).astype(xf_ref.dtype)

    # y[b] = W2d[b] @ xF[b]:  one (Tn, N*J) x (N*J, Fp) MXU matmul per batch.
    y = jnp.einsum("bnk,bko->bno", w_ref[...], xf_ref[...],
                   preferred_element_type=jnp.float32)

    if with_bn:
        y_ref[...] = y.astype(y_ref.dtype)
        # Fused BN statistics (bias dropped: cancelled by the mean subtraction).
        y2d = y.reshape(-1, y.shape[-1])
        s1 = jnp.sum(y2d, axis=0, keepdims=True)
        s2 = jnp.sum(y2d * y2d, axis=0, keepdims=True)

        @pl.when(ni == 0)
        def _():
            st_ref[...] = jnp.zeros_like(st_ref)

        st_ref[...] += jnp.concatenate([s1, s2], axis=0)[None]
    else:
        y_ref[...] = (y + bias_ref[...]).astype(y_ref.dtype)


def _bn_apply_kernel(y_ref, scale_ref, shift_ref, o_ref):
    """o = y[:, :Fout] * scale + shift  (per-feature scale/shift precomputed)."""
    fout = o_ref.shape[-1]
    y = y_ref[...]
    o_ref[...] = (y[:, :fout] * scale_ref[...] + shift_ref[...]).astype(o_ref.dtype)


def gconv_forward(W, x, fc_weight, fc_bias, gamma, beta, *, J, bn_bool=True,
                  eps=1e-5, compute_dtype=jnp.float32):
    """Pallas implementation of Gconv.forward. Returns (W, y)."""
    B, N, N2, Jw = W.shape
    assert N2 == N and Jw == J
    Fin = x.shape[-1]
    Fout = fc_weight.shape[0]
    num_inputs = J * Fin
    assert fc_weight.shape == (Fout, num_inputs)

    NJ = N * J
    Fp = _round_up(Fout, _LANE)                 # lane-dense stores / full MXU width
    itemsize = jnp.dtype(compute_dtype).itemsize

    # ---- layout-only glue (NO HBM transpose of W) ---------------------------
    W2d = W.reshape(B, N, NJ).astype(compute_dtype)        # free contiguous reshape
    xc = x.astype(compute_dtype)
    fcw_p = jnp.pad(fc_weight, ((0, Fp - Fout), (0, 0)))   # (Fp, J*Fin), zero-padded
    fcw2 = jnp.transpose(fcw_p.reshape(Fp, J, Fin), (2, 1, 0)).reshape(Fin, J * Fp)
    fcw2 = fcw2.astype(compute_dtype)
    bias_p = jnp.pad(fc_bias, (0, Fp - Fout)).reshape(1, Fp).astype(jnp.float32)

    # ---- tile selection (VMEM-budgeted; keep >=2 grid steps for v7x megacore) --
    per_batch = (2 * (N * NJ * itemsize + N * Fin * itemsize + N * Fp * 4)
                 + NJ * Fp * itemsize)
    bt_cap = max(1, min(_VMEM_BUDGET // max(per_batch, 1),
                        _cdiv(2 * 1024 * 1024, max(N * NJ * itemsize, 1))))
    if B >= 2:
        bt_cap = min(bt_cap, B // 2)
    Bt = _pick_batch_tile(B, max(1, bt_cap))

    fixed = Bt * (2 * N * Fin * itemsize + NJ * Fp * itemsize)
    per_row = Bt * 2 * (NJ * itemsize + Fp * 4)
    if fixed + per_row * N > _VMEM_BUDGET:
        row_cap = max(_SUBLANE, max(_VMEM_BUDGET - fixed, 0) // max(per_row, 1))
        Tn = _pick_row_tile(N, row_cap)
    else:
        Tn = N

    grid = (B // Bt, N // Tn)
    compiler_params = pltpu.CompilerParams(
        dimension_semantics=("parallel", "arbitrary"),
        vmem_limit_bytes=_VMEM_LIMIT)

    w_spec = pl.BlockSpec((Bt, Tn, NJ), lambda bi, ni: (bi, ni, 0))
    x_spec = pl.BlockSpec((Bt, N, Fin), lambda bi, ni: (bi, 0, 0))
    fcw_spec = pl.BlockSpec((Fin, J * Fp), lambda bi, ni: (0, 0))
    y_spec = pl.BlockSpec((Bt, Tn, Fp), lambda bi, ni: (bi, ni, 0))
    scratch = [pltpu.VMEM((Bt, NJ, Fp), compute_dtype)]

    if bn_bool:
        n_bt = B // Bt
        y_pre, stats = pl.pallas_call(
            functools.partial(_gconv_kernel, with_bn=True),
            out_shape=(jax.ShapeDtypeStruct((B, N, Fp), jnp.float32),
                       jax.ShapeDtypeStruct((n_bt, 2, Fp), jnp.float32)),
            grid_spec=pltpu.PrefetchScalarGridSpec(
                num_scalar_prefetch=0,
                grid=grid,
                in_specs=[w_spec, x_spec, fcw_spec],
                out_specs=[y_spec,
                           pl.BlockSpec((1, 2, Fp), lambda bi, ni: (bi, 0, 0))],
                scratch_shapes=scratch),
            compiler_params=compiler_params,
        )(W2d, xc, fcw2)

        # Tiny per-feature finalization of the fused statistics (Fp-length vectors).
        s = jnp.sum(stats, axis=0)                       # (2, Fp)
        count = float(B * N)
        mean = s[0] / count
        var = jnp.maximum(s[1] / count - mean * mean, 0.0)   # biased var (PyTorch BN)
        inv = jax.lax.rsqrt(var + eps)
        scale = (gamma * inv[:Fout]).reshape(1, Fout).astype(jnp.float32)
        shift = (beta - mean[:Fout] * gamma * inv[:Fout]).reshape(1, Fout).astype(jnp.float32)

        # Tiled, megacore-parallel BN apply over lane-dense (rows, Fp) slabs.
        rows = B * N
        y2d = y_pre.reshape(rows, Fp)                    # free reshape
        row_bytes = 2 * Fp * 4 + 2 * Fout * 4
        tr_cap = max(_SUBLANE, _VMEM_BUDGET // max(row_bytes, 1))
        if rows >= 2 * _SUBLANE:
            tr_cap = min(tr_cap, rows // 2)
        Tr = _pick_row_tile(rows, tr_cap)

        y_out = pl.pallas_call(
            _bn_apply_kernel,
            out_shape=jax.ShapeDtypeStruct((rows, Fout), jnp.float32),
            grid_spec=pltpu.PrefetchScalarGridSpec(
                num_scalar_prefetch=0,
                grid=(rows // Tr,),
                in_specs=[pl.BlockSpec((Tr, Fp), lambda i: (i, 0)),
                          pl.BlockSpec((1, Fout), lambda i: (0, 0)),
                          pl.BlockSpec((1, Fout), lambda i: (0, 0))],
                out_specs=pl.BlockSpec((Tr, Fout), lambda i: (i, 0))),
            compiler_params=pltpu.CompilerParams(
                dimension_semantics=("parallel",),
                vmem_limit_bytes=_VMEM_LIMIT),
        )(y2d, scale, shift)
        return W, y_out.reshape(B, N, Fout)

    # bn_bool=False: bias added in-kernel; slice off the lane padding.
    y_pre = pl.pallas_call(
        functools.partial(_gconv_kernel, with_bn=False),
        out_shape=jax.ShapeDtypeStruct((B, N, Fp), jnp.float32),
        grid_spec=pltpu.PrefetchScalarGridSpec(
            num_scalar_prefetch=0,
            grid=grid,
            in_specs=[w_spec, x_spec, fcw_spec,
                      pl.BlockSpec((1, Fp), lambda bi, ni: (0, 0))],
            out_specs=y_spec,
            scratch_shapes=scratch),
        compiler_params=compiler_params,
    )(W2d, xc, fcw2, bias_p)
    return W, y_pre[..., :Fout]


if __name__ == "__main__":
    # Small shapes consistent with the module's forward.
    B, N, Fin, Fout, J = 2, 16, 8, 32, 2
    num_inputs = J * Fin

    key = jax.random.PRNGKey(0)
    k1, k2, k3, k4 = jax.random.split(key, 4)

    W = jax.random.normal(k1, (B, N, N, J), jnp.float32)
    x = jax.random.normal(k2, (B, N, Fin), jnp.float32)

    bound = 1.0 / (num_inputs ** 0.5)
    fc_weight = jax.random.uniform(k3, (Fout, num_inputs), jnp.float32, -bound, bound)
    fc_bias = jax.random.uniform(k4, (Fout,), jnp.float32, -bound, bound)
    gamma = jnp.ones((Fout,), jnp.float32)
    beta = jnp.zeros((Fout,), jnp.float32)

    # Pure-JAX reference of the PyTorch forward.
    gm = jnp.einsum("bnmj,bmf->bnjf", W, x).reshape(B, N, num_inputs)
    yr = gm.reshape(-1, num_inputs) @ fc_weight.T + fc_bias
    mean = yr.mean(axis=0, keepdims=True)
    var = ((yr - mean) ** 2).mean(axis=0, keepdims=True)
    yr_bn = ((yr - mean) / jnp.sqrt(var + 1e-5) * gamma + beta).reshape(B, N, Fout)
    yr_nobn = yr.reshape(B, N, Fout)

    # f32 path with fused BN.
    _, y = gconv_forward(W, x, fc_weight, fc_bias, gamma, beta, J=J, bn_bool=True)
    y = jax.block_until_ready(y)
    assert y.shape == (B, N, Fout)
    assert jnp.allclose(y, yr_bn, atol=1e-4, rtol=1e-4), "BN path mismatch vs reference"

    # f32 path without BN (bias path).
    _, y_nb = gconv_forward(W, x, fc_weight, fc_bias, gamma, beta, J=J, bn_bool=False)
    y_nb = jax.block_until_ready(y_nb)
    assert jnp.allclose(y_nb, yr_nobn, atol=1e-4, rtol=1e-4), "no-BN path mismatch"

    # bf16 W/x path (halves W's HBM traffic on v6e/v7x; f32 accumulation kept).
    _, y_bf = gconv_forward(W, x, fc_weight, fc_bias, gamma, beta, J=J, bn_bool=True,
                            compute_dtype=jnp.bfloat16)
    y_bf = jax.block_until_ready(y_bf)
    assert jnp.allclose(y_bf, yr_bn, atol=1e-1, rtol=1e-1), "bf16 path mismatch"

    print("KERNEL_OK")
</pallas_src>

<mosaic_0001>
module attributes {stable_mosaic.version = 11 : i64} {
  func.func @_gconv_kernel(%arg0: i32, %arg1: i32, %arg2: memref<1x16x32xf32, #tpu.memory_space<vmem>>, %arg3: memref<1x16x8xf32, #tpu.memory_space<vmem>>, %arg4: memref<8x256xf32, #tpu.memory_space<vmem>>, %arg5: memref<1x16x128xf32, #tpu.memory_space<vmem>>, %arg6: memref<1x2x128xf32, #tpu.memory_space<vmem>>, %arg7: memref<1x32x128xf32, #tpu.memory_space<vmem>>) attributes {dimension_semantics = [#tpu.dimension_semantics<parallel>, #tpu.dimension_semantics<arbitrary>], iteration_bounds = array<i64: 2, 1>, scalar_prefetch = 0 : i64, scratch_operands = 1 : i64, tpu.core_type = #tpu.core_type<tc>, window_params = [{transform_indices = @transform_0, window_bounds = array<i64: 1, 16, 32>}, {transform_indices = @transform_1, window_bounds = array<i64: 1, 16, 8>}, {pipeline_mode = #tpu.pipeline_mode<synchronous>, transform_indices = @transform_2, window_bounds = array<i64: 8, 256>}, {transform_indices = @transform_3, window_bounds = array<i64: 1, 16, 128>}, {transform_indices = @transform_4, window_bounds = array<i64: 1, 2, 128>}]} {
    %c0_i32 = arith.constant 0 : i32
    %0 = arith.cmpi eq, %arg1, %c0_i32 : i32
    %1 = arith.extui %0 : i1 to i32
    %c0_i32_0 = arith.constant 0 : i32
    %2 = arith.cmpi ne, %1, %c0_i32_0 : i32
    scf.if %2 {
      %c0_19 = arith.constant 0 : index
      %c0_20 = arith.constant 0 : index
      %c0_21 = arith.constant 0 : index
      %21 = vector.load %arg3[%c0_19, %c0_20, %c0_21] : memref<1x16x8xf32, #tpu.memory_space<vmem>>, vector<1x16x8xf32>
      %22 = vector.shape_cast %21 : vector<1x16x8xf32> to vector<16x8xf32>
      %c0_22 = arith.constant 0 : index
      %c0_23 = arith.constant 0 : index
      %23 = vector.load %arg4[%c0_22, %c0_23] : memref<8x256xf32, #tpu.memory_space<vmem>>, vector<8x256xf32>
      %cst_24 = arith.constant dense<0.000000e+00> : vector<16x256xf32>
      %24 = tpu.matmul %22, %23, %cst_24 {dimension_numbers = #tpu.dot_dimension_numbers<[1], [0], [0], [1], [0, 0, 1, 1], [], []>} : vector<16x8xf32>, vector<8x256xf32>, vector<16x256xf32> -> vector<16x256xf32>
      %25 = vector.shape_cast %24 : vector<16x256xf32> to vector<1x32x128xf32>
      %c0_25 = arith.constant 0 : index
      %c0_26 = arith.constant 0 : index
      %c0_27 = arith.constant 0 : index
      %26 = vector.load %arg7[%c0_25, %c0_26, %c0_27] : memref<1x32x128xf32, #tpu.memory_space<vmem>>, vector<1x32x128xf32>
      tpu.vector_store %arg7[%c0_25, %c0_26, %c0_27], %25 {strides = array<i32>} : memref<1x32x128xf32, #tpu.memory_space<vmem>>, vector<1x32x128xf32>,
    } else {
    }
    %c0 = arith.constant 0 : index
    %c0_1 = arith.constant 0 : index
    %c0_2 = arith.constant 0 : index
    %3 = vector.load %arg2[%c0, %c0_1, %c0_2] : memref<1x16x32xf32, #tpu.memory_space<vmem>>, vector<1x16x32xf32>
    %c0_3 = arith.constant 0 : index
    %c0_4 = arith.constant 0 : index
    %c0_5 = arith.constant 0 : index
    %4 = vector.load %arg7[%c0_3, %c0_4, %c0_5] : memref<1x32x128xf32, #tpu.memory_space<vmem>>, vector<1x32x128xf32>
    "tpu.trace_start"() <{level = 10 : i32, message = "bnk,bko->bno"}> : () -> ()
    %cst = arith.constant dense<0.000000e+00> : vector<1x16x128xf32>
    %5 = tpu.matmul %3, %4, %cst {dimension_numbers = #tpu.dot_dimension_numbers<[2], [1], [1], [2], [0, 0, 0, 1, 1, 2], [0], [0]>} : vector<1x16x32xf32>, vector<1x32x128xf32>, vector<1x16x128xf32> -> vector<1x16x128xf32>
    "tpu.trace_stop"() : () -> ()
    %c0_6 = arith.constant 0 : index
    %c0_7 = arith.constant 0 : index
    %c0_8 = arith.constant 0 : index
    %6 = vector.load %arg5[%c0_6, %c0_7, %c0_8] : memref<1x16x128xf32, #tpu.memory_space<vmem>>, vector<1x16x128xf32>
    tpu.vector_store %arg5[%c0_6, %c0_7, %c0_8], %5 {strides = array<i32>} : memref<1x16x128xf32, #tpu.memory_space<vmem>>, vector<1x16x128xf32>,
    %7 = vector.shape_cast %5 : vector<1x16x128xf32> to vector<16x128xf32>
    %cst_9 = arith.constant dense<0.000000e+00> : vector<128xf32>
    %8 = vector.multi_reduction <add>, %7, %cst_9 [0] : vector<16x128xf32> to vector<128xf32>
    %9 = vector.shape_cast %8 : vector<128xf32> to vector<1x128xf32>
    %10 = arith.mulf %7, %7 : vector<16x128xf32>
    %cst_10 = arith.constant dense<0.000000e+00> : vector<128xf32>
    %11 = vector.multi_reduction <add>, %10, %cst_10 [0] : vector<16x128xf32> to vector<128xf32>
    %12 = vector.shape_cast %11 : vector<128xf32> to vector<1x128xf32>
    %c0_i32_11 = arith.constant 0 : i32
    %13 = arith.cmpi eq, %arg1, %c0_i32_11 : i32
    %14 = arith.extui %13 : i1 to i32
    %c0_i32_12 = arith.constant 0 : i32
    %15 = arith.cmpi ne, %14, %c0_i32_12 : i32
    scf.if %15 {
      %cst_19 = arith.constant 0.000000e+00 : f32
      %21 = vector.broadcast %cst_19 : f32 to vector<1x2x128xf32>
      %c0_20 = arith.constant 0 : index
      %c0_21 = arith.constant 0 : index
      %c0_22 = arith.constant 0 : index
      %22 = vector.load %arg6[%c0_20, %c0_21, %c0_22] : memref<1x2x128xf32, #tpu.memory_space<vmem>>, vector<1x2x128xf32>
      tpu.vector_store %arg6[%c0_20, %c0_21, %c0_22], %21 {strides = array<i32>} : memref<1x2x128xf32, #tpu.memory_space<vmem>>, vector<1x2x128xf32>,
    } else {
    }
    %c0_13 = arith.constant 0 : index
    %c0_14 = arith.constant 0 : index
    %c0_15 = arith.constant 0 : index
    %16 = vector.load %arg6[%c0_13, %c0_14, %c0_15] : memref<1x2x128xf32, #tpu.memory_space<vmem>>, vector<1x2x128xf32>
    %17 = tpu.concatenate %9, %12 in 0 : vector<1x128xf32>, vector<1x128xf32> -> vector<2x128xf32>
    %18 = vector.shape_cast %17 : vector<2x128xf32> to vector<1x2x128xf32>
    %19 = arith.addf %16, %18 : vector<1x2x128xf32>
    %c0_16 = arith.constant 0 : index
    %c0_17 = arith.constant 0 : index
    %c0_18 = arith.constant 0 : index
    %20 = vector.load %arg6[%c0_16, %c0_17, %c0_18] : memref<1x2x128xf32, #tpu.memory_space<vmem>>, vector<1x2x128xf32>
    tpu.vector_store %arg6[%c0_16, %c0_17, %c0_18], %19 {strides = array<i32>} : memref<1x2x128xf32, #tpu.memory_space<vmem>>, vector<1x2x128xf32>,
    return
  }
  func.func @transform_0(%arg0: i32, %arg1: i32) -> (i32, i32, i32) {
    %c0_i32 = arith.constant 0 : i32
    %c0_i32_0 = arith.constant 0 : i32
    return %arg0, %arg1, %c0_i32 : i32, i32, i32
  }
  func.func @transform_1(%arg0: i32, %arg1: i32) -> (i32, i32, i32) {
    %c0_i32 = arith.constant 0 : i32
    %c0_i32_0 = arith.constant 0 : i32
    %c0_i32_1 = arith.constant 0 : i32
    return %arg0, %c0_i32, %c0_i32_0 : i32, i32, i32
  }
  func.func @transform_2(%arg0: i32, %arg1: i32) -> (i32, i32) {
    %c0_i32 = arith.constant 0 : i32
    %c0_i32_0 = arith.constant 0 : i32
    %c0_i32_1 = arith.constant 0 : i32
    return %c0_i32, %c0_i32_0 : i32, i32
  }
  func.func @transform_3(%arg0: i32, %arg1: i32) -> (i32, i32, i32) {
    %c0_i32 = arith.constant 0 : i32
    %c0_i32_0 = arith.constant 0 : i32
    return %arg0, %arg1, %c0_i32 : i32, i32, i32
  }
  func.func @transform_4(%arg0: i32, %arg1: i32) -> (i32, i32, i32) {
    %c0_i32 = arith.constant 0 : i32
    %c0_i32_0 = arith.constant 0 : i32
    %c0_i32_1 = arith.constant 0 : i32
    return %arg0, %c0_i32, %c0_i32_0 : i32, i32, i32
  }
}

</mosaic_0001>

<bundles_post_ra>
// kernel: tpu_custom_call.1
= control target key start
LH: loop header
LB: loop body
LE: loop exit
PB: predicated region body
PF: predicated region fallthrough
CT: control target
= control target key end

     0   :  { %10 = vsyncpa [#allocation4], 0  ;;  %s1065_s0 = inlined_call_operand.vmem [shape: f32[2,16,32], index: 0, kind: input, shape index: {}]   ;;  %s1066_s1 = inlined_call_operand.vmem [shape: f32[2,16,8], index: 1, kind: input, shape index: {}]   ;;  %s1067_s2 = inlined_call_operand.vmem [shape: f32[8,256], index: 2, kind: input, shape index: {}]   ;;  %s1068_s3 = inlined_call_operand.hbm [shape: f32[2,16,128], index: 3, kind: output, shape index: {0}]   ;;  %s1069_s4 = inlined_call_operand.hbm [shape: f32[2,2,128], index: 4, kind: output, shape index: {1}]  }
   0x1   :  { %12 = vsyncpa [#allocation4 + $0x1], 0 }
   0x2   :  { %13 = vsyncpa [#allocation6], 0 }
   0x3   :  { %15 = vsyncpa [#allocation6 + $0x1], 0  ;;  %s913_s15 = smov 0   ;;  %s915_s16 = smov 0  }
   0x4   :  { %s917_s17 = smov 0   ;;  %s919_s18 = smov 0  }
   0x5   :  { %s921_s19 = smov 0   ;;  %s923_s20 = smov 0  }
   0x6 LB: > { %s666_s21 = sadd.s32 4294967295, %s881_s20   ;;  %s667_s22 = sadd.s32 4294967294, %s881_s20   ;;  %s881_s20 = sphi %s923_s20, %s21_s20   ;;  %s877_s19 = sphi %s921_s19, %s1076_s19   ;;  %s873_s18 = sphi %s919_s18, %s1075_s18   ;;  %s869_s17 = sphi %s917_s17, %s1074_s17   ;;  %s865_s16 = sphi %s915_s16, %s1073_s16   ;;  %s861_s15 = sphi %s913_s15, %s1072_s15  }
   0x7   : > { %s33_s23 = sadd.s32 1, %s877_s19  ;;  %s117_s24 = sadd.s32 1, %s869_s17 }
   0x8   : > { %p35_p0 = scmp.ge.s32.totalorder %s33_s23, 2  ;;  %p127_p1 = scmp.ne.s32.totalorder %s869_s17, %s865_s16 }
   0x9   : > { %p128_p2 = scmp.eq.s32.totalorder %s666_s21, 1  ;;  %p133_p3 = scmp.ne.s32.totalorder %s865_s16, %s861_s15 }
   0xa   : > { %s1078_s23 = smov (%p35_p0, %s33_s23), 0  ;;  %p134_p5 = scmp.eq.s32.totalorder %s667_s22, 1 }
   0xb   : > { %p953_p4 = por %p128_p2, %p127_p1  ;;  %s112_s26 = ssub.s32 %s877_s19, %s1078_s23 }
   0xc   : > { %p670_p6 = scmp.ge.s32.totalorder %s881_s20, 1  ;;  %p115_p7 = scmp.eq.s32.totalorder %s112_s26, 0 }
   0xd   : > { %p960_p8 = por %p134_p5, %p133_p3  ;;  %p202_p9 = scmp.lt.s32.totalorder %s881_s20, 3 }
   0xe   : > { %s966_s28 = scalar_select %p115_p7, %s869_s17, %s117_s24  }
   0xf   : > { %p203_p10 = pnand %p670_p6, %p202_p9 }
  0x10   : > { %s975_s7 = sand.u32 (!%p203_p10), 1, %s865_s16   ;;  %p243_p11 = scmp.lt.s32.totalorder (!%p203_p10), %s873_s18, 1 }
  0x11   : > { %206 = sbr.rel (%p203_p10) target bundleno = 481 (0x1e1), region = 32  ;;  %s672_s8 = sshll.u32 (!%p203_p10), %s975_s7, 1 }
  0x12   : > { %s979_s9 = scalar_lea.vmem (!%p203_p10), [#allocation5], %s672_s8  ;;  %s671_s26 = sshll.u32 (!%p203_p10), %s975_s7, 4 }
  0x13   : > { %s234_s29 = scalar_lea.vmem (!%p203_p10), [#allocation3], %s671_s26  ;;  %s694_s5 = sshll.u32 (!%p203_p10), %s873_s18, 8 }
  0x14   : > { %s530_s30 = sshll.u32 (!%p203_p10), %s234_s29, 4  ;;  %s884_s13 = smov (!%p203_p10), [#allocation3]   ;;  %s993_s30 = int_to_ptr.vmem [resolvable:$true] %s530_s30 }
  0x15   : > { %s775_s12 = scalar_lea.vmem (!%p203_p10), %s993_s30, 256 }
  0x16   : > { %v265_v0 = vld [vmem:[%s1067_s2 + $0x8] sm:$0xff]  ;;  %v264_v1 = vld [vmem:[%s1067_s2] sm:$0xff]  ;;  %v883_v2 = vmov 0.0   ;;  %s244_s10 = scalar_select %p243_p11, %s873_s18, 1  ;;  %vm266_vm0 = vcmask 64512   ;;  %vm400_vm1 = vcmask 261120  }
  0x17   : > { %303 = vmatprep.subr.mxu0 %v265_v0  ;;  %337 = vmatprep.mubr.f32.mxu0 %v883_v2  ;;  %503 = vst [vmem:[%s979_s9] sm:$0x3] %v883_v2  ;;  %p776_p12 = scmp.ne.s32.totalorder %s993_s30, %s775_s12 }
  0x18   : > { %304 = vmatpush1.msra.mxu0 %v264_v1  ;;  %s692_s11 = sshll.u32 %s244_s10, 4  ;;  %s998_s10 = scalar_lea.hbm %s1068_s3, %s694_s5 }
  0x19   : > { %s256_s14 = scalar_lea.vmem %s1066_s1, %s692_s11  ;;  %s250_s24 = scalar_lea.vmem %s1065_s0, %s692_s11 }
  0x1a   : > { %v262_v3 = vld [vmem:[%s256_s14] sm:$0xff]  ;;  %v263_v4 = vld [vmem:[%s256_s14 + $0x8] sm:$0xff]  ;;  %s510_s11 = scalar_lea.sflag [#allocation4], %s975_s7  ;;  %p777_p13 = pnand %p776_p12, %p953_p4 }
  0x1b   : > { %677 = vmatmul.mubr.msk.f32.vlgmr.msra.gmra.mxu0 %vm266_vm0, %v262_v3  ;;  %v394_v5 = vld [vmem:[%s250_s24] sm:$0xff]  ;;  %v395_v18 = vld [vmem:[%s250_s24 + $0x8] sm:$0xff]  ;;  %s779_s14 = sshll.u32 %s884_s13, 4  ;;  %s780_s14 = int_to_ptr.vmem [resolvable:$false] %s779_s14 }
  0x1c   : > { %343 = vmatprep.mubr.f32.mxu0 %v883_v2  ;;  %709 = vmatprep.mubr.msk.f32.mxu1 %vm400_vm1, %v394_v5  ;;  %p778_p0 = pneg %p777_p13  ;;  %s781_s21 = scalar_lea.vmem %s780_s14, 512 }
  0x1d   : > { %p782_p1 = scmp.lt.s32.totalorder %s993_s30, %s780_s14  ;;  %p783_p2 = scmp.lt.s32.totalorder %s781_s21, %s775_s12 }
  0x1f   : > { %678 = vmatmul.mubr.msk.f32.gmra.mxu0 %vm266_vm0, %v263_v4  ;;  %p784_p3 = por %p783_p2, %p782_p1 }
  0x21   : > { %p785_p5 = pnand %p784_p3, %p778_p0 }
  0xdb   : > { %v339_v6 = vpop.f32.mrf.mxu0 }
  0xdd   : > { %v341_v7 = vpop.f32.mrf.mxu0 }
  0xde   : > { %v354_v8 = vcombine.low %v339_v6, %v341_v7  ;;  %v355_v9 = vcombine.high %v339_v6, %v341_v7 }
  0xdf   : > { %v345_v10 = vpop.f32.mrf.mxu0 }
  0xe0   : > { %679 = vst.sshfl [vmem:[#allocation2] sm:$0xff pattern:$0x75316420] %v354_v8  ;;  %680 = vst.sshfl [vmem:[#allocation2 + $0x8] sm:$0xff pattern:$0x75316420] %v355_v9 }
  0xe1   : > { %v347_v11 = vpop.f32.mrf.mxu0 }
  0xe2   : > { %v356_v12 = vcombine.low %v345_v10, %v347_v11  ;;  %v357_v13 = vcombine.high %v345_v10, %v347_v11 }
  0xe4   : > { %681 = vst.sshfl [vmem:[#allocation2 + $0x10] sm:$0xff pattern:$0x75316420] %v356_v12  ;;  %682 = vst.sshfl [vmem:[#allocation2 + $0x18] sm:$0xff pattern:$0x75316420] %v357_v13 }
  0xe7   : > { %v397_v16 = vld [vmem:[#allocation2 + $0x8] sm:$0xff]  ;;  %v396_v17 = vld [vmem:[#allocation2] sm:$0xff] }
  0xeb   : > { %v399_v14 = vld [vmem:[#allocation2 + $0x18] sm:$0xff]  ;;  %v398_v15 = vld [vmem:[#allocation2 + $0x10] sm:$0xff] }
  0xec   : > { %701 = vmatprep.subr.mxu1 %v399_v14 }
  0xed   : > { %702 = vmatpush3.msra.mxu1 %v399_v14 }
  0xee   : > { %703 = vmatprep.subr.mxu1 %v398_v15 }
  0xef   : > { %704 = vmatpush3.msra.mxu1 %v398_v15 }
  0xf0   : > { %705 = vmatprep.subr.mxu1 %v397_v16 }
  0xf1   : > { %706 = vmatpush3.msra.mxu1 %v397_v16 }
  0xf2   : > { %707 = vmatprep.subr.mxu1 %v396_v17 }
  0xf3   : > { %708 = vmatpush3.msra.mxu1 %v396_v17 }
  0xf4   : > { %710 = vmatmul.mubr.msk.f32.vlgmr.msra.gmra.mxu1 %vm400_vm1, %v395_v18 }
 0x1b4   : > { %v711_v19 = vpop.f32.mrf.mxu1 }
 0x1b5   : > { %483 = vst [vmem:[%s234_s29 + $0x8] sm:$0xff] %v711_v19  ;;  %v492_v21 = vmul.f32 %v711_v19, %v711_v19 }
 0x1b6   : > { %v473_v20 = vpop.f32.mrf.mxu1 }
 0x1b7   : > { %482 = vst [vmem:[%s234_s29] sm:$0xff] %v473_v20  ;;  %v484_v22 = vadd.f32 %v711_v19, %v473_v20  ;;  %v491_v23 = vmul.f32 %v473_v20, %v473_v20 }
 0x1b8   : > { %788 = shalt.err (!%p785_p5)
}
 0x1b9   : > { %s789_s22 = scalar_lea.hbm %s998_s10, 256  ;;  %s793_s29 = scalar_lea.hbm %s1068_s3, 512 }
 0x1ba   : > { %p790_p6 = scmp.ne.s32.totalorder %s998_s10, %s789_s22  ;;  %p794_p10 = scmp.lt.s32.totalorder %s998_s10, %s1068_s3 }
 0x1bb   : > { %p795_p11 = scmp.lt.s32.totalorder %s793_s29, %s789_s22 }
 0x1bc   : > { %p791_p7 = pnand %p790_p6, %p953_p4 }
 0x1bd   : > { %p796_p12 = por %p795_p11, %p794_p10 }
 0x1be   : > { %p792_p9 = pneg %p791_p7 }
 0x1c0   : > { %p797_p13 = pnand %p796_p12, %p792_p9 }
 0x1c2   : > { %800 = shalt.err (!%p797_p13)
}
 0x1c3   : > { %s885_s8 = smov 128   ;;  %s886_s12 = smov 8   ;;  %v485_v24 = vrot.slane %v484_v22, 4  ;;  %v493_v25 = vadd.f32 %v492_v21, %v491_v23  ;;  %vm505_vm2 = vcmask 1040384   ;;  %v504_v37 = vld [vmem:[%s979_s9] sm:$0x3] }
 0x1c4   : > { %712 = dma.vmem_to_hbm [thread:$0]  (%p953_p4), %s993_s30, 256, %s998_s10, %s510_s11, %s885_s8, %s885_s8, %s886_s12  }
 0x1c5   : > { %v486_v26 = vadd.f32 %v485_v24, %v484_v22  ;;  %v494_v27 = vrot.slane %v493_v25, 4  ;;  %s689_s30 = sshll.u32 %s873_s18, 5  ;;  %s546_s10 = sshll.u32 %s979_s9, 4  ;;  %s547_s10 = int_to_ptr.vmem [resolvable:$true] %s546_s10 }
 0x1c6   : > { %s544_s14 = scalar_lea.hbm %s1069_s4, %s689_s30  ;;  %s515_s21 = scalar_lea.sflag [#allocation6], %s975_s7 }
 0x1c7   : > { %v487_v28 = vrot.slane %v486_v26, 2  ;;  %v495_v29 = vadd.f32 %v494_v27, %v493_v25  ;;  %s801_s22 = scalar_lea.vmem %s547_s10, 32  ;;  %s887_s24 = smov [#allocation5]  }
 0x1c8   : > { %p802_p0 = scmp.ne.s32.totalorder %s547_s10, %s801_s22  ;;  %s805_s26 = sshll.u32 %s887_s24, 4  ;;  %s806_s26 = int_to_ptr.vmem [resolvable:$false] %s805_s26 }
 0x1c9   : > { %v488_v30 = vadd.f32 %v487_v28, %v486_v26  ;;  %v496_v31 = vrot.slane %v495_v29, 2  ;;  %s807_s29 = scalar_lea.vmem %s806_s26, 64  ;;  %p808_p3 = scmp.lt.s32.totalorder %s547_s10, %s806_s26 }
 0x1ca   : > { %p803_p1 = pnand %p802_p0, %p953_p4  ;;  %p809_p5 = scmp.lt.s32.totalorder %s807_s29, %s801_s22 }
 0x1cb   : > { %v489_v32 = vrot.slane %v488_v30, 1  ;;  %v497_v33 = vadd.f32 %v496_v31, %v495_v29 }
 0x1cc   : > { %p804_p2 = pneg %p803_p1  ;;  %p810_p6 = por %p809_p5, %p808_p3 }
 0x1cd   : > { %v498_v34 = vrot.slane %v497_v33, 1  ;;  %v490_v35 = vadd.f32 %v489_v32, %v488_v30 }
 0x1ce   : > { %p811_p7 = pnand %p810_p6, %p804_p2 }
 0x1cf   : > { %v499_v36 = vadd.f32 %v498_v34, %v497_v33 }
 0x1d1   : > { %v506_v38 = vsel %vm505_vm2, %v490_v35, %v499_v36 }
 0x1d2   : > { %v507_v39 = vadd.f32 %v506_v38, %v504_v37 }
 0x1d4   : > { %508 = vst [vmem:[%s979_s9] sm:$0x3] %v507_v39 }
 0x1d5   : > { %814 = shalt.err (!%p811_p7)
}
 0x1d6   : > { %s815_s18 = scalar_lea.hbm %s544_s14, 32  ;;  %s819_s5 = scalar_lea.hbm %s1069_s4, 64 }
 0x1d7   : > { %p816_p9 = scmp.ne.s32.totalorder %s544_s14, %s815_s18  ;;  %p820_p12 = scmp.lt.s32.totalorder %s544_s14, %s1069_s4 }
 0x1d8   : > { %p821_p13 = scmp.lt.s32.totalorder %s819_s5, %s815_s18 }
 0x1d9   : > { %p817_p10 = pnand %p816_p9, %p953_p4 }
 0x1da   : > { %p822_p0 = por %p821_p13, %p820_p12 }
 0x1db   : > { %p818_p11 = pneg %p817_p10 }
 0x1dd   : > { %p823_p1 = pnand %p822_p0, %p818_p11 }
 0x1df   : > { %826 = shalt.err (!%p823_p1)
}
 0x1e0   : > { %713 = dma.vmem_to_hbm [thread:$0]  (%p953_p4), %s547_s10, 32, %s544_s14, %s515_s21  }
 0x1e1 PF: > { %p723_p2 = scmp.ge.s32.totalorder %s881_s20, 2  ;;  %s558_s12 = sand.u32 1, %s861_s15  }
 0x1e2   : > { %s559_s30 = scalar_lea.sflag [#allocation4], %s558_s12 }
 0x1e3   : > { %p717_p3 = pnand %p723_p2, %p960_p8 }
 0x1e5   : > { %p718_p5 = pneg %p717_p3 }
 0x1e7   : > { %852 = dma.done.wait (%p718_p5), %s559_s30, 256  }
 0x1e8   : > { %854 = vsyncadd (%p718_p5), %s559_s30, 4294967040  ;;  %s568_s11 = scalar_lea.sflag [#allocation6], %s558_s12 }
 0x1e9   : > { %856 = dma.done.wait (%p718_p5), %s568_s11, 32  }
 0x1ea   : > { %858 = vsyncadd (%p718_p5), %s568_s11, 4294967264  ;;  %s21_s20 = sadd.s32 1, %s881_s20   ;;  %s1072_s15 = smov %s865_s16 }
 0x1eb   : > { %p18_p6 = scmp.ge.s32.totalorder %s21_s20, 4   ;;  %s1073_s16 = smov %s869_s17 }
 0x1ec   : > { %s1074_s17 = smov %s966_s28  ;;  %s1075_s18 = smov %s877_s19 }
 0x1ed   : > { %s1076_s19 = smov %s1078_s23  ;;  %20 = sbr.rel (!%p18_p6) target bundleno = 6 (0x6), region = 95 }
 0x1f2   :  { %573 = vsyncpa [#allocation4], 1 }
 0x1f3   :  { %575 = vsyncpa [#allocation4 + $0x1], 1 }
 0x1f4   :  { %576 = vsyncpa [#allocation6], 1 }
 0x1f5   :  { %578 = vsyncpa [#allocation6 + $0x1], 1 }

</bundles_post_ra>
